<compile_context>
chip_gen: v7x
topology: tpu7x:2x2x1
jax: 0.10.0
libtpu: 0.0.40
codegen_flags: <defaults>
</compile_context>

<pallas_src>
import functools

import jax
import jax.numpy as jnp
from jax.experimental import pallas as pl
from jax.experimental.pallas import tpu as pltpu


def _round_up(x, m):
    return ((x + m - 1) // m) * m


def _attention_kernel(z_ref, w1b_ref, b1t_ref, w2t_ref, out_ref, beta_ref, *, M, D, H):
    # z_ref:   (TN, M*D)  lane-dense flattened input tile
    # w1b_ref: (M*D, M*H) block-diagonal first projection (kron(I_M, W1))
    # b1t_ref: (1, M*H)   bias, tiled per view
    # w2t_ref: (1, M*H)   second-projection weights, tiled per view
    z = z_ref[...].astype(jnp.float32)                                   # (TN, M*D)

    # --- projection: Linear -> tanh, done directly on the lane-dense slab ---
    h = jnp.dot(z, w1b_ref[...], preferred_element_type=jnp.float32)     # (TN, M*H)
    h = jnp.tanh(h + b1t_ref[...])

    # --- second projection (output width 1 per view) as VPU multiply + reduce ---
    hw = h * w2t_ref[...]                                                # (TN, M*H)
    w_cols = [
        jnp.sum(hw[:, m * H:(m + 1) * H], axis=1, keepdims=True) for m in range(M)
    ]
    w = jnp.concatenate(w_cols, axis=1)                                  # (TN, M)

    # --- softmax over the M (view) axis ---
    w_max = jnp.max(w, axis=1, keepdims=True)
    e = jnp.exp(w - w_max)
    denom = jnp.sum(e, axis=1, keepdims=True)
    beta = e * pl.reciprocal(denom, approx=True)                         # (TN, M)

    # --- weighted sum over views: out = sum_m beta[:, m] * z[:, m*D:(m+1)*D] ---
    out = beta[:, 0:1] * z[:, 0:D]
    for m in range(1, M):
        out = out + beta[:, m:m + 1] * z[:, m * D:(m + 1) * D]           # (TN, D)

    out_ref[...] = out.astype(out_ref.dtype)
    beta_ref[...] = beta.astype(beta_ref.dtype)


def attention_forward(z, w1, b1, w2, *, tn=1024):
    """z: (N, M, D); w1: (D, H); b1: (H,); w2: (H, 1).

    Returns (out (N, D), beta (N, M, 1)) matching the PyTorch module.
    """
    N, M, D = z.shape
    H = w1.shape[1]
    MD, MH = M * D, M * H

    # Lane-dense flatten + batch padding to a multiple of the tile size.
    tn_eff = min(int(tn), _round_up(N, 8))
    tn_eff = _round_up(tn_eff, 8)
    n_pad = _round_up(N, tn_eff)

    z2 = z.reshape(N, MD)
    if n_pad != N:
        z2 = jnp.pad(z2, ((0, n_pad - N), (0, 0)))

    # Block-diagonal W1 so the first Linear runs on the flattened (TN, M*D) tile.
    w1_block = jnp.kron(jnp.eye(M, dtype=w1.dtype), w1)        # (M*D, M*H)
    b1_tiled = jnp.tile(b1.reshape(1, H), (1, M))              # (1, M*H)
    w2_tiled = jnp.tile(w2.reshape(1, H), (1, M))              # (1, M*H)

    grid = (n_pad // tn_eff,)
    out_shapes = (
        jax.ShapeDtypeStruct((n_pad, D), z.dtype),
        jax.ShapeDtypeStruct((n_pad, M), z.dtype),
    )

    kernel = functools.partial(_attention_kernel, M=M, D=D, H=H)

    out_full, beta_full = pl.pallas_call(
        kernel,
        out_shape=out_shapes,
        grid_spec=pltpu.PrefetchScalarGridSpec(
            num_scalar_prefetch=0,
            grid=grid,
            in_specs=[
                pl.BlockSpec((tn_eff, MD), lambda i: (i, 0)),   # z (lane-dense tile)
                pl.BlockSpec((MD, MH), lambda i: (0, 0)),       # block-diag W1
                pl.BlockSpec((1, MH), lambda i: (0, 0)),        # tiled b1
                pl.BlockSpec((1, MH), lambda i: (0, 0)),        # tiled w2
            ],
            out_specs=[
                pl.BlockSpec((tn_eff, D), lambda i: (i, 0)),    # pooled output
                pl.BlockSpec((tn_eff, M), lambda i: (i, 0)),    # beta (lane-dense 2D)
            ],
        ),
        compiler_params=pltpu.CompilerParams(
            dimension_semantics=("parallel",),
        ),
    )(z2, w1_block, b1_tiled, w2_tiled)

    out = out_full[:N]
    beta = beta_full[:N].reshape(N, M, 1)
    return out, beta


def attention_ref(z, w1, b1, w2):
    """Pure-JAX reference (mirrors the PyTorch forward)."""
    w = jnp.tanh(z @ w1 + b1) @ w2                # (N, M, 1)
    beta = jax.nn.softmax(w, axis=1)              # (N, M, 1)
    return (beta * z).sum(axis=1), beta


if __name__ == "__main__":
    # Small shapes implied by the module: in_size=32, hidden_size=16,
    # batch N=8, M=4 "views" being attended over.
    N, M, D, H = 8, 4, 32, 16

    key = jax.random.PRNGKey(0)
    k_z, k_w1, k_b1, k_w2 = jax.random.split(key, 4)

    z = jax.random.normal(k_z, (N, M, D), dtype=jnp.float32)
    # Deterministic synthetic parameters (Linear(in_size, hidden) and Linear(hidden, 1)).
    w1 = jax.random.normal(k_w1, (D, H), dtype=jnp.float32) * 0.1
    b1 = jax.random.normal(k_b1, (H,), dtype=jnp.float32) * 0.1
    w2 = jax.random.normal(k_w2, (H, 1), dtype=jnp.float32) * 0.1

    out, beta = attention_forward(z, w1, b1, w2, tn=1024)
    out = jax.block_until_ready(out)
    beta = jax.block_until_ready(beta)

    # Sanity-check against the pure-JAX reference (approx reciprocal -> 1e-3 tol).
    out_r, beta_r = attention_ref(z, w1, b1, w2)
    assert out.shape == (N, D) and beta.shape == (N, M, 1)
    assert jnp.allclose(out, out_r, atol=1e-3, rtol=1e-3)
    assert jnp.allclose(beta, beta_r, atol=1e-3, rtol=1e-3)

    print("KERNEL_OK")
</pallas_src>

<mosaic_0001>
module attributes {stable_mosaic.version = 11 : i64} {
  func.func @_attention_kernel(%arg0: i32, %arg1: memref<8x128xf32, #tpu.memory_space<vmem>>, %arg2: memref<128x64xf32, #tpu.memory_space<vmem>>, %arg3: memref<1x64xf32, #tpu.memory_space<vmem>>, %arg4: memref<1x64xf32, #tpu.memory_space<vmem>>, %arg5: memref<8x32xf32, #tpu.memory_space<vmem>>, %arg6: memref<8x4xf32, #tpu.memory_space<vmem>>) attributes {dimension_semantics = [#tpu.dimension_semantics<parallel>], iteration_bounds = array<i64: 1>, scalar_prefetch = 0 : i64, scratch_operands = 0 : i64, tpu.core_type = #tpu.core_type<tc>, window_params = [{transform_indices = @transform_0, window_bounds = array<i64: 8, 128>}, {pipeline_mode = #tpu.pipeline_mode<synchronous>, transform_indices = @transform_1, window_bounds = array<i64: 128, 64>}, {pipeline_mode = #tpu.pipeline_mode<synchronous>, transform_indices = @transform_2, window_bounds = array<i64: 1, 64>}, {pipeline_mode = #tpu.pipeline_mode<synchronous>, transform_indices = @transform_3, window_bounds = array<i64: 1, 64>}, {transform_indices = @transform_4, window_bounds = array<i64: 8, 32>}, {transform_indices = @transform_5, window_bounds = array<i64: 8, 4>}]} {
    %c0 = arith.constant 0 : index
    %c0_0 = arith.constant 0 : index
    %0 = vector.load %arg1[%c0, %c0_0] : memref<8x128xf32, #tpu.memory_space<vmem>>, vector<8x128xf32>
    %c0_1 = arith.constant 0 : index
    %c0_2 = arith.constant 0 : index
    %1 = vector.load %arg2[%c0_1, %c0_2] : memref<128x64xf32, #tpu.memory_space<vmem>>, vector<128x64xf32>
    %cst = arith.constant dense<0.000000e+00> : vector<8x64xf32>
    %2 = tpu.matmul %0, %1, %cst {dimension_numbers = #tpu.dot_dimension_numbers<[1], [0], [0], [1], [0, 0, 1, 1], [], []>} : vector<8x128xf32>, vector<128x64xf32>, vector<8x64xf32> -> vector<8x64xf32>
    %c0_3 = arith.constant 0 : index
    %c0_4 = arith.constant 0 : index
    %3 = vector.load %arg3[%c0_3, %c0_4] : memref<1x64xf32, #tpu.memory_space<vmem>>, vector<1x64xf32>
    %4 = vector.broadcast %3 : vector<1x64xf32> to vector<8x64xf32>
    %5 = arith.addf %2, %4 : vector<8x64xf32>
    %6 = math.tanh %5 : vector<8x64xf32>
    %c0_5 = arith.constant 0 : index
    %c0_6 = arith.constant 0 : index
    %7 = vector.load %arg4[%c0_5, %c0_6] : memref<1x64xf32, #tpu.memory_space<vmem>>, vector<1x64xf32>
    %8 = vector.broadcast %7 : vector<1x64xf32> to vector<8x64xf32>
    %9 = arith.mulf %6, %8 : vector<8x64xf32>
    %10 = vector.extract_strided_slice %9 {offsets = [0, 0], sizes = [8, 16], strides = [1, 1]} : vector<8x64xf32> to vector<8x16xf32>
    %cst_7 = arith.constant dense<0.000000e+00> : vector<8xf32>
    %11 = vector.multi_reduction <add>, %10, %cst_7 [1] : vector<8x16xf32> to vector<8xf32>
    %12 = vector.shape_cast %11 : vector<8xf32> to vector<8x1xf32>
    %13 = vector.extract_strided_slice %9 {offsets = [0, 16], sizes = [8, 16], strides = [1, 1]} : vector<8x64xf32> to vector<8x16xf32>
    %cst_8 = arith.constant dense<0.000000e+00> : vector<8xf32>
    %14 = vector.multi_reduction <add>, %13, %cst_8 [1] : vector<8x16xf32> to vector<8xf32>
    %15 = vector.shape_cast %14 : vector<8xf32> to vector<8x1xf32>
    %16 = vector.extract_strided_slice %9 {offsets = [0, 32], sizes = [8, 16], strides = [1, 1]} : vector<8x64xf32> to vector<8x16xf32>
    %cst_9 = arith.constant dense<0.000000e+00> : vector<8xf32>
    %17 = vector.multi_reduction <add>, %16, %cst_9 [1] : vector<8x16xf32> to vector<8xf32>
    %18 = vector.shape_cast %17 : vector<8xf32> to vector<8x1xf32>
    %19 = vector.extract_strided_slice %9 {offsets = [0, 48], sizes = [8, 16], strides = [1, 1]} : vector<8x64xf32> to vector<8x16xf32>
    %cst_10 = arith.constant dense<0.000000e+00> : vector<8xf32>
    %20 = vector.multi_reduction <add>, %19, %cst_10 [1] : vector<8x16xf32> to vector<8xf32>
    %21 = vector.shape_cast %20 : vector<8xf32> to vector<8x1xf32>
    %22 = tpu.concatenate %12, %15, %18, %21 in 1 : vector<8x1xf32>, vector<8x1xf32>, vector<8x1xf32>, vector<8x1xf32> -> vector<8x4xf32>
    %cst_11 = arith.constant dense<0xFF800000> : vector<8xf32>
    %23 = vector.multi_reduction <maximumf>, %22, %cst_11 [1] : vector<8x4xf32> to vector<8xf32>
    %24 = vector.shape_cast %23 : vector<8xf32> to vector<8x1xf32>
    %25 = vector.broadcast %24 : vector<8x1xf32> to vector<8x4xf32>
    %26 = arith.subf %22, %25 : vector<8x4xf32>
    %27 = math.exp %26 : vector<8x4xf32>
    %cst_12 = arith.constant dense<0.000000e+00> : vector<8xf32>
    %28 = vector.multi_reduction <add>, %27, %cst_12 [1] : vector<8x4xf32> to vector<8xf32>
    %29 = vector.shape_cast %28 : vector<8xf32> to vector<8x1xf32>
    %30 = tpu.reciprocal %29 {approx = true} : vector<8x1xf32> -> vector<8x1xf32>
    %31 = vector.broadcast %30 : vector<8x1xf32> to vector<8x4xf32>
    %32 = arith.mulf %27, %31 : vector<8x4xf32>
    %33 = vector.extract_strided_slice %32 {offsets = [0, 0], sizes = [8, 1], strides = [1, 1]} : vector<8x4xf32> to vector<8x1xf32>
    %34 = vector.extract_strided_slice %0 {offsets = [0, 0], sizes = [8, 32], strides = [1, 1]} : vector<8x128xf32> to vector<8x32xf32>
    %35 = vector.broadcast %33 : vector<8x1xf32> to vector<8x32xf32>
    %36 = arith.mulf %35, %34 : vector<8x32xf32>
    %37 = vector.extract_strided_slice %32 {offsets = [0, 1], sizes = [8, 1], strides = [1, 1]} : vector<8x4xf32> to vector<8x1xf32>
    %38 = vector.extract_strided_slice %0 {offsets = [0, 32], sizes = [8, 32], strides = [1, 1]} : vector<8x128xf32> to vector<8x32xf32>
    %39 = vector.broadcast %37 : vector<8x1xf32> to vector<8x32xf32>
    %40 = arith.mulf %39, %38 : vector<8x32xf32>
    %41 = arith.addf %36, %40 : vector<8x32xf32>
    %42 = vector.extract_strided_slice %32 {offsets = [0, 2], sizes = [8, 1], strides = [1, 1]} : vector<8x4xf32> to vector<8x1xf32>
    %43 = vector.extract_strided_slice %0 {offsets = [0, 64], sizes = [8, 32], strides = [1, 1]} : vector<8x128xf32> to vector<8x32xf32>
    %44 = vector.broadcast %42 : vector<8x1xf32> to vector<8x32xf32>
    %45 = arith.mulf %44, %43 : vector<8x32xf32>
    %46 = arith.addf %41, %45 : vector<8x32xf32>
    %47 = vector.extract_strided_slice %32 {offsets = [0, 3], sizes = [8, 1], strides = [1, 1]} : vector<8x4xf32> to vector<8x1xf32>
    %48 = vector.extract_strided_slice %0 {offsets = [0, 96], sizes = [8, 32], strides = [1, 1]} : vector<8x128xf32> to vector<8x32xf32>
    %49 = vector.broadcast %47 : vector<8x1xf32> to vector<8x32xf32>
    %50 = arith.mulf %49, %48 : vector<8x32xf32>
    %51 = arith.addf %46, %50 : vector<8x32xf32>
    %c0_13 = arith.constant 0 : index
    %c0_14 = arith.constant 0 : index
    %52 = vector.load %arg5[%c0_13, %c0_14] : memref<8x32xf32, #tpu.memory_space<vmem>>, vector<8x32xf32>
    tpu.vector_store %arg5[%c0_13, %c0_14], %51 {strides = array<i32>} : memref<8x32xf32, #tpu.memory_space<vmem>>, vector<8x32xf32>,
    %c0_15 = arith.constant 0 : index
    %c0_16 = arith.constant 0 : index
    %53 = vector.load %arg6[%c0_15, %c0_16] : memref<8x4xf32, #tpu.memory_space<vmem>>, vector<8x4xf32>
    tpu.vector_store %arg6[%c0_15, %c0_16], %32 {strides = array<i32>} : memref<8x4xf32, #tpu.memory_space<vmem>>, vector<8x4xf32>,
    return
  }
  func.func @transform_0(%arg0: i32) -> (i32, i32) {
    %c0_i32 = arith.constant 0 : i32
    %c0_i32_0 = arith.constant 0 : i32
    return %arg0, %c0_i32 : i32, i32
  }
  func.func @transform_1(%arg0: i32) -> (i32, i32) {
    %c0_i32 = arith.constant 0 : i32
    %c0_i32_0 = arith.constant 0 : i32
    %c0_i32_1 = arith.constant 0 : i32
    return %c0_i32, %c0_i32_0 : i32, i32
  }
  func.func @transform_2(%arg0: i32) -> (i32, i32) {
    %c0_i32 = arith.constant 0 : i32
    %c0_i32_0 = arith.constant 0 : i32
    %c0_i32_1 = arith.constant 0 : i32
    return %c0_i32, %c0_i32_0 : i32, i32
  }
  func.func @transform_3(%arg0: i32) -> (i32, i32) {
    %c0_i32 = arith.constant 0 : i32
    %c0_i32_0 = arith.constant 0 : i32
    %c0_i32_1 = arith.constant 0 : i32
    return %c0_i32, %c0_i32_0 : i32, i32
  }
  func.func @transform_4(%arg0: i32) -> (i32, i32) {
    %c0_i32 = arith.constant 0 : i32
    %c0_i32_0 = arith.constant 0 : i32
    return %arg0, %c0_i32 : i32, i32
  }
  func.func @transform_5(%arg0: i32) -> (i32, i32) {
    %c0_i32 = arith.constant 0 : i32
    %c0_i32_0 = arith.constant 0 : i32
    return %arg0, %c0_i32 : i32, i32
  }
}

</mosaic_0001>

<bundles_post_ra>
// kernel: tpu_custom_call.1
= control target key start
LH: loop header
LB: loop body
LE: loop exit
PB: predicated region body
PF: predicated region fallthrough
CT: control target
= control target key end

     0   :  { %v347_v3 = vmov 0.0|0.0   ;;  %vm348_vm0 = vmmov 0   ;;  %v349_v6 = vmov 0.0   ;;  %s474_s0 = inlined_call_operand.vmem [shape: f32[8,128], index: 0, kind: input, shape index: {}]   ;;  %s475_s1 = inlined_call_operand.vmem [shape: f32[128,64], index: 1, kind: input, shape index: {}]   ;;  %s476_s2 = inlined_call_operand.vmem [shape: f32[1,64], index: 2, kind: input, shape index: {}]   ;;  %s477_s3 = inlined_call_operand.vmem [shape: f32[1,64], index: 3, kind: input, shape index: {}]   ;;  %s478_s4 = inlined_call_operand.hbm [shape: f32[8,32], index: 4, kind: output, shape index: {0}]   ;;  %s479_s5 = inlined_call_operand.vmem [shape: f32[8,4], index: 5, kind: output, shape index: {1}]  }
   0x1   :  { %v21_v0 = vld [vmem:[%s475_s1] sm:$0xff]  ;;  %v22_v1 = vld [vmem:[%s475_s1 + $0x8] sm:$0xff]  ;;  %v23_v2 = vld [vmem:[%s475_s1 + $0x10] sm:$0xff]  ;;  %275 = vmatprep.subr.bf16.mxu0 %v347_v3  ;;  %272 = vmatprep.mubr.msk.f32.mxu0 %vm348_vm0, %v349_v6 }
   0x2   :  { %v276_v4 = vpack.c.bf16 %v22_v1, %v21_v0  ;;  %v24_v5 = vld [vmem:[%s475_s1 + $0x18] sm:$0xff]  ;;  %v25_v8 = vld [vmem:[%s475_s1 + $0x20] sm:$0xff]  ;;  %v26_v9 = vld [vmem:[%s475_s1 + $0x28] sm:$0xff] }
   0x3   :  { %v279_v7 = vpack.c.bf16 %v24_v5, %v23_v2 }
   0x4   :  { %277 = vmatpush3.bf16.msra.mxu0 %v276_v4 }
   0x5   :  { %278 = vmatprep.subr.bf16.mxu0 %v347_v3 }
   0x6   :  { %11 = vsyncpa [#allocation3], 0  ;;  %v282_v10 = vpack.c.bf16 %v26_v9, %v25_v8  ;;  %v27_v11 = vld [vmem:[%s475_s1 + $0x30] sm:$0xff]  ;;  %v28_v12 = vld [vmem:[%s475_s1 + $0x38] sm:$0xff]  ;;  %s350_s30 = smov 80   ;;  %s352_s6 = smov 96  }
   0x7   :  { %v285_v13 = vpack.c.bf16 %v28_v12, %v27_v11  ;;  %v29_v14 = vld [vmem:[%s475_s1 + $0x40] sm:$0xff]  ;;  %v30_v15 = vld [vmem:[%s475_s1 + $0x48] sm:$0xff]  ;;  %v31_v17 = vld [vmem:[%s475_s1 + $0x50] sm:$0xff]  ;;  %vm123_vm1 = vcmask 130048   ;;  %vm146_vm2 = vcmask 7168   ;;  %vm148_vm3 = vcmask 15360  }
   0x8   :  { %280 = vmatpush3.bf16.msra.mxu0 %v279_v7  ;;  %v288_v16 = vpack.c.bf16 %v30_v15, %v29_v14  ;;  %v32_v18 = vld [vmem:[%s475_s1 + $0x58] sm:$0xff]  ;;  %v33_v20 = vld [vmem:[%s475_s1 + $0x60] sm:$0xff]  ;;  %v34_v21 = vld [vmem:[%s475_s1 + $0x68] sm:$0xff]  ;;  %vm150_vm4 = vcmask 23552   ;;  %vm152_vm5 = vcmask 31744   ;;  %v353_v54 = vmov 2  }
   0x9   :  { %281 = vmatprep.subr.bf16.mxu0 %v347_v3  ;;  %v291_v19 = vpack.c.bf16 %v32_v18, %v31_v17  ;;  %v294_v22 = vpack.c.bf16 %v34_v21, %v33_v20  ;;  %v35_v23 = vld [vmem:[%s475_s1 + $0x70] sm:$0xff]  ;;  %v36_v24 = vld [vmem:[%s475_s1 + $0x78] sm:$0xff]  ;;  %v441_v26 = vld [vmem:[%s474_s0] sm:$0xff]  ;;  %s351_s0 = smov 112   ;;  %313 = vset.pattern.permute.xlu1 %v353_v54  ;;  %v354_v55 = vmov 1   ;;  %v355_v59 = vmov 3  }
   0xa   :  { %v297_v25 = vpack.c.bf16 %v36_v24, %v35_v23  ;;  %v221_v27 = vld [vmem:[%s476_s2] ss:$0 sm:$0xff]  ;;  %312 = vset.pattern.permute.xlu0 %v354_v55  ;;  %v356_v60 = vmov 0   ;;  %s357_s7 = smov 64   ;;  %s359_s8 = smov [#allocation2]   ;;  %vm200_vm6 = vcmask 261120  }
   0xb   :  { %v222_v31 = vld [vmem:[%s477_s3] ss:$0 sm:$0xff]  ;;  %s209_s9 = sshll.u32 %s359_s8, 4  ;;  %s210_s9 = int_to_ptr.vmem [resolvable:$true] %s209_s9 }
   0xc   :  { %283 = vmatpush3.bf16.msra.mxu0 %v282_v10  ;;  %s323_s10 = scalar_lea.vmem %s210_s9, 128  ;;  %p328_p1 = scmp.lt.s32.totalorder %s210_s9, %s210_s9 }
   0xd   :  { %284 = vmatprep.subr.bf16.mxu0 %v347_v3  ;;  %p324_p0 = scmp.ne.s32.totalorder %s210_s9, %s323_s10  ;;  %p329_p2 = scmp.lt.s32.totalorder %s323_s10, %s323_s10 }
   0xf   :  { %p330_p3 = por %p329_p2, %p328_p1 }
  0x10   :  { %286 = vmatpush3.bf16.msra.mxu0 %v285_v13 }
  0x11   :  { %287 = vmatprep.subr.bf16.mxu0 %v347_v3  ;;  %p331_p4 = pnand %p330_p3, %p324_p0 }
  0x14   :  { %289 = vmatpush3.bf16.msra.mxu0 %v288_v16 }
  0x15   :  { %290 = vmatprep.subr.bf16.mxu0 %v347_v3 }
  0x18   :  { %292 = vmatpush3.bf16.msra.mxu0 %v291_v19 }
  0x19   :  { %293 = vmatprep.subr.bf16.mxu0 %v347_v3 }
  0x1c   :  { %295 = vmatpush3.bf16.msra.mxu0 %v294_v22 }
  0x1d   :  { %296 = vmatprep.subr.bf16.mxu0 %v347_v3 }
  0x20   :  { %298 = vmatpush3.bf16.msra.mxu0 %v297_v25 }
  0x23   :  { %273 = vmatmul.mubr.f32.vlgmr.msra.gmra.mrb[0].mxu0 %v441_v26 }
  0xf6   :  { %v110_v28 = vpop.f32.mrb[0].mxu0 }
  0xf7   :  { %v111_v29 = vadd.f32 %v221_v27, %v110_v28  ;;  %v274_v30 = vpop.f32.mrb[1].mxu0 }
  0xf9   :  { %317 = vtanh.f32 %v111_v29 }
 0x103   :  { %v318_v32 = vpop.eup %317 }
 0x104   :  { %v122_v33 = vmul.f32 %v318_v32, %v222_v31 }
 0x106   :  { %140 = vrot.lane.b32.xlu1 %v122_v33, %s350_s30  ;;  %128 = vrot.lane.b32.xlu0 %v122_v33, %s351_s0  ;;  %v124_v34 = vsel %vm123_vm1, %v122_v33, 0.0 }
 0x10a   :  { %134 = vrot.lane.b32.xlu0 %v122_v33, %s352_s6 }
 0x12a   :  { %125 = vadd.xlane.f32.xlu1 %v124_v34 }
 0x178   :  { %v141_v35 = vpop.permute.xlu1 %140  ;;  %v129_v36 = vpop.permute.xlu0 %128 }
 0x179   :  { %v131_v37 = vsel %vm123_vm1, %v129_v36, 0.0  ;;  %v143_v38 = vsel %vm123_vm1, %v141_v35, 0.0 }
 0x17a   :  { %132 = vadd.xlane.f32.xlu0 %v131_v37  ;;  %144 = vadd.xlane.f32.xlu1 %v143_v38 }
 0x17c   :  { %v135_v39 = vpop.permute.xlu0 %134 }
 0x17d   :  { %v137_v40 = vsel %vm123_vm1, %v135_v39, 0.0 }
 0x17e   :  { %138 = vadd.xlane.f32.xlu0 %v137_v40 }
 0x1b7   :  { %v126_v42 = vpop.xlane.xlu1 %125 }
 0x207   :  { %v133_v41 = vpop.xlane.xlu0 %132  ;;  %v145_v45 = vpop.xlane.xlu1 %144 }
 0x208   :  { %v147_v43 = vsel %vm146_vm2, %v126_v42, %v133_v41 }
 0x20b   :  { %v139_v44 = vpop.xlane.xlu0 %138 }
 0x20c   :  { %v149_v46 = vsel %vm148_vm3, %v147_v43, %v139_v44 }
 0x20d   :  { %v151_v47 = vsel %vm150_vm4, %v149_v46, %v145_v45 }
 0x20e   :  { %v153_v48 = vsel %vm152_vm5, %v151_v47, -inf }
 0x20f   :  { %154 = vmax.xlane.f32.xlu0 %v153_v48 }
 0x29c   :  { %v155_v49 = vpop.xlane.xlu0 %154 }
 0x29d   :  { %v156_v50 = vsub.f32 %v151_v47, %v155_v49 }
 0x29f   :  { %v157_v51 = vmul.f32 1.442695, %v156_v50 }
 0x2a1   :  { %319 = vpow2.f32 %v157_v51 }
 0x2ab   :  { %v320_v52 = vpop.eup %319 }
 0x2ac   :  { %v159_v53 = vsel %vm152_vm5, %v320_v52, 0.0 }
 0x2ad   :  { %160 = vadd.xlane.f32.xlu1 %v159_v53 }
 0x33a   :  { %v161_v56 = vpop.xlane.xlu1 %160 }
 0x33b   :  { %321 = vrcp.f32 %v161_v56 }
 0x345   :  { %v322_v57 = vpop.eup %321 }
 0x346   :  { %v163_v58 = vmul.f32 %v322_v57, %v320_v52 }
 0x348   :  { %202 = vst.msk [vmem:[%s479_s5] sm:$0xff] %vm152_vm5, %v163_v58  ;;  %181 = vperm.xlu1 %313, %v163_v58   ;;  %171 = vperm.xlu0 %312, %v163_v58   ;;  %s358_s5 = smov 32  }
 0x34c   :  { %314 = vset.pattern.permute.xlu1 %v355_v59  ;;  %316 = vset.pattern.permute.xlu0 %v355_v59 }
 0x34d   :  { %191 = vperm.xlu1 %314, %v163_v58  }
 0x351   :  { %315 = vset.pattern.permute.xlu1 %v356_v60 }
 0x352   :  { %166 = vperm.xlu1 %315, %v163_v58  }
 0x3c7   :  { %v182_v61 = vpop.permute.xlu1 %181  ;;  %v172_v62 = vpop.permute.xlu0 %171 }
 0x3c8   :  { %v174_v63 = vmul.f32 %v172_v62, %v441_v26  ;;  %v184_v0 = vmul.f32 %v182_v61, %v441_v26 }
 0x3ca   :  { %176 = vrot.lane.b32.xlu1 %v174_v63, %s352_s6 }
 0x3cc   :  { %v192_v1 = vpop.permute.xlu1 %191 }
 0x3cd   :  { %v194_v2 = vmul.f32 %v192_v1, %v441_v26 }
 0x3ce   :  { %186 = vrot.lane.b32.xlu1 %v184_v0, %s357_s7 }
 0x3d1   :  { %v167_v3 = vpop.permute.xlu1 %166 }
 0x3d2   :  { %196 = vrot.lane.b32.xlu1 %v194_v2, %s358_s5  ;;  %v169_v5 = vmul.f32 %v167_v3, %v441_v26 }
 0x43c   :  { %v177_v4 = vpop.permute.xlu1 %176 }
 0x43d   :  { %v179_v7 = vadd.f32 %v177_v4, %v169_v5 }
 0x440   :  { %v187_v6 = vpop.permute.xlu1 %186 }
 0x441   :  { %v189_v8 = vadd.f32 %v187_v6, %v179_v7 }
 0x444   :  { %v197_v9 = vpop.permute.xlu1 %196 }
 0x445   :  { %v199_v10 = vadd.f32 %v197_v9, %v189_v8 }
 0x447   :  { %201 = vst.msk [vmem:[#allocation2] sm:$0xff] %vm200_vm6, %v199_v10 }
 0x448   :  { %334 = shalt.err (!%p331_p4)
}
 0x449   :  { %s335_s13 = scalar_lea.hbm %s478_s4, 128 }
 0x44a   :  { %p336_p5 = scmp.ne.s32.totalorder %s478_s4, %s335_s13  ;;  %p339_p6 = scmp.lt.u32.totalorder %s335_s13, %s478_s4 }
 0x44c   :  { %p341_p7 = pnand %p339_p6, %p336_p5 }
 0x44e   :  { %344 = shalt.err (!%p341_p7)
}
 0x44f   :  { %212 = dma.vmem_to_hbm [thread:$0]  %s210_s9, 128, %s478_s4, [#allocation3]  }
 0x450   :  { %345 = dma.done.wait [#allocation3], 128  }
 0x451   :  { %346 = vsyncadd [#allocation3], 4294967168 }
 0x452   :  { %220 = vsyncpa [#allocation3], 1 }

</bundles_post_ra>
